<compile_context>
chip_gen: v7x
topology: tpu7x:2x2x1
jax: 0.10.0
libtpu: 0.0.40
codegen_flags: <defaults>
</compile_context>

<pallas_src>
import functools

import jax
import jax.numpy as jnp
from jax.experimental import pallas as pl
from jax.experimental.pallas import tpu as pltpu


def _round_up(v, m):
    return ((v + m - 1) // m) * m


def peatnet_kernel(x_ref, w1_ref, b1_ref, w2_ref, b2_ref, w3_ref, b3_ref, o_ref):
    """Fused fc1->ReLU->fc2->ReLU->fc3 on one [in_p, tile_b] lane-dense slab of the batch."""
    mm_dtype = w1_ref.dtype  # bf16 or f32; all dots accumulate in f32 either way.

    x = x_ref[...]                                                 # [in_p, tb] lane-dense
    h1 = jnp.dot(w1_ref[...], x, preferred_element_type=jnp.float32) + b1_ref[...]
    h1 = jnp.maximum(h1, 0.0)                                      # f32 elementwise (v5e-safe)
    h2 = jnp.dot(w2_ref[...], h1.astype(mm_dtype),
                 preferred_element_type=jnp.float32) + b2_ref[...]
    h2 = jnp.maximum(h2, 0.0)
    out = jnp.dot(w3_ref[...], h2.astype(mm_dtype),
                  preferred_element_type=jnp.float32) + b3_ref[...]
    o_ref[...] = out.astype(o_ref.dtype)                           # [out_p, tb] unmasked store


@functools.partial(jax.jit, static_argnames=("block_b", "use_bf16_matmul"))
def peatnet_forward(x, w1, b1, w2, b2, w3, b3, *, block_b=512, use_bf16_matmul=True):
    """PeatNet forward.

    x:  [B, input_size]                      (same layout as the torch module input)
    w*: torch nn.Linear layout [out_features, in_features]
    b*: [out_features]
    Returns [B, output_size] in x.dtype.
    """
    B, in_dim = x.shape
    h1_dim, h2_dim, out_dim = w1.shape[0], w2.shape[0], w3.shape[0]
    out_dtype = x.dtype

    # ---- sublane-friendly feature padding (multiples of 8; zero rows stay zero thru ReLU) ----
    in_p = _round_up(in_dim, 8)
    h1_p = _round_up(h1_dim, 8)
    h2_p = _round_up(h2_dim, 8)
    out_p = _round_up(out_dim, 8)

    # ---- batch tiling on the lane axis (tile must be a multiple of 128 lanes) ----
    tb = max(128, (min(block_b, 2048) // 128) * 128)
    n_steps = pl.cdiv(B, tb)
    Bp = n_steps * tb

    # ---- lane-dense layout & compute dtypes ----
    mm_dtype = jnp.bfloat16 if use_bf16_matmul else x.dtype
    x_t = x.T.astype(mm_dtype)                                     # [in_dim, B]
    x_t = jnp.pad(x_t, ((0, in_p - in_dim), (0, Bp - B)))          # zero-pad features & batch

    def pad_wb(w, b, rows_p, cols_p):
        wp = jnp.pad(w.astype(mm_dtype),
                     ((0, rows_p - w.shape[0]), (0, cols_p - w.shape[1])))
        bp = jnp.pad(b.astype(jnp.float32), (0, rows_p - b.shape[0])).reshape(rows_p, 1)
        return wp, bp

    w1c, b1c = pad_wb(w1, b1, h1_p, in_p)
    w2c, b2c = pad_wb(w2, b2, h2_p, h1_p)
    w3c, b3c = pad_wb(w3, b3, out_p, h2_p)

    def const_spec(shape):
        # Small weights/biases: full block, re-used (same block index) at every grid step.
        return pl.BlockSpec(shape, lambda i: (0, 0))

    itemsize = jnp.dtype(mm_dtype).itemsize
    cost = pl.CostEstimate(
        flops=2 * Bp * (in_p * h1_p + h1_p * h2_p + h2_p * out_p),
        transcendentals=0,
        bytes_accessed=(Bp * in_p * itemsize
                        + (w1c.size + w2c.size + w3c.size) * itemsize
                        + (h1_p + h2_p + out_p) * 4
                        + Bp * out_p * jnp.dtype(out_dtype).itemsize),
    )

    out_t = pl.pallas_call(
        peatnet_kernel,
        out_shape=jax.ShapeDtypeStruct((out_p, Bp), out_dtype),
        grid_spec=pltpu.PrefetchScalarGridSpec(
            num_scalar_prefetch=0,
            grid=(n_steps,),
            in_specs=[
                pl.BlockSpec((in_p, tb), lambda i: (0, i)),        # batch tile on lanes
                const_spec(w1c.shape), const_spec(b1c.shape),
                const_spec(w2c.shape), const_spec(b2c.shape),
                const_spec(w3c.shape), const_spec(b3c.shape),
            ],
            out_specs=pl.BlockSpec((out_p, tb), lambda i: (0, i)),
        ),
        compiler_params=pltpu.CompilerParams(
            # Batch steps are independent -> shard across v7x's 2 TensorCores
            # (no-op on single-TC v5e/v6e).
            dimension_semantics=("parallel",),
        ),
        cost_estimate=cost,
    )(x_t, w1c, b1c, w2c, b2c, w3c, b3c)

    return out_t[:out_dim, :B].T                                   # back to [B, out_dim]


def init_linear_params(key, in_features, out_features):
    """Deterministic init mimicking torch.nn.Linear (uniform +/- 1/sqrt(fan_in)).
    Returns W in torch layout [out, in] and bias [out]."""
    kw, kb = jax.random.split(key)
    bound = 1.0 / jnp.sqrt(jnp.float32(in_features))
    w = jax.random.uniform(kw, (out_features, in_features), jnp.float32, -bound, bound)
    b = jax.random.uniform(kb, (out_features,), jnp.float32, -bound, bound)
    return w, b


if __name__ == "__main__":
    # Shapes consistent with PeatNet(input_size=16, output_size=4).
    input_size, hidden1, hidden2, output_size = 16, 32, 16, 4
    batch = 300  # deliberately not a multiple of the tile; wrapper pads/trims

    root = jax.random.PRNGKey(0)
    kx, k1, k2, k3 = jax.random.split(root, 4)

    x = jax.random.normal(kx, (batch, input_size), jnp.float32)
    w1, b1 = init_linear_params(k1, input_size, hidden1)
    w2, b2 = init_linear_params(k2, hidden1, hidden2)
    w3, b3 = init_linear_params(k3, hidden2, output_size)

    # Pure-JAX reference of the module forward (torch layout: x @ W.T + b).
    ref = jnp.maximum(x @ w1.T + b1, 0.0)
    ref = jnp.maximum(ref @ w2.T + b2, 0.0)
    ref = ref @ w3.T + b3

    # f32 path: tight match.
    out_f32 = jax.block_until_ready(
        peatnet_forward(x, w1, b1, w2, b2, w3, b3, block_b=128, use_bf16_matmul=False))
    assert out_f32.shape == (batch, output_size)
    assert jnp.allclose(out_f32, ref, atol=1e-5, rtol=1e-5)

    # bf16-matmul / f32-accumulate path (fast MXU path on v6e/v7x): loose match.
    out_bf16 = jax.block_until_ready(
        peatnet_forward(x, w1, b1, w2, b2, w3, b3, block_b=512, use_bf16_matmul=True))
    assert out_bf16.shape == (batch, output_size)
    assert jnp.allclose(out_bf16, ref, atol=5e-2, rtol=5e-2)

    print("KERNEL_OK")
</pallas_src>

<mosaic_0001>
module attributes {stable_mosaic.version = 11 : i64} {
  func.func @peatnet_kernel(%arg0: i32, %arg1: memref<16x128xf32, #tpu.memory_space<vmem>>, %arg2: memref<32x16xf32, #tpu.memory_space<vmem>>, %arg3: memref<32x1xf32, #tpu.memory_space<vmem>>, %arg4: memref<16x32xf32, #tpu.memory_space<vmem>>, %arg5: memref<16x1xf32, #tpu.memory_space<vmem>>, %arg6: memref<8x16xf32, #tpu.memory_space<vmem>>, %arg7: memref<8x1xf32, #tpu.memory_space<vmem>>, %arg8: memref<8x128xf32, #tpu.memory_space<vmem>>) attributes {dimension_semantics = [#tpu.dimension_semantics<parallel>], iteration_bounds = array<i64: 3>, scalar_prefetch = 0 : i64, scratch_operands = 0 : i64, tpu.core_type = #tpu.core_type<tc>, window_params = [{transform_indices = @transform_0, window_bounds = array<i64: 16, 128>}, {pipeline_mode = #tpu.pipeline_mode<synchronous>, transform_indices = @transform_1, window_bounds = array<i64: 32, 16>}, {pipeline_mode = #tpu.pipeline_mode<synchronous>, transform_indices = @transform_2, window_bounds = array<i64: 32, 1>}, {pipeline_mode = #tpu.pipeline_mode<synchronous>, transform_indices = @transform_3, window_bounds = array<i64: 16, 32>}, {pipeline_mode = #tpu.pipeline_mode<synchronous>, transform_indices = @transform_4, window_bounds = array<i64: 16, 1>}, {pipeline_mode = #tpu.pipeline_mode<synchronous>, transform_indices = @transform_5, window_bounds = array<i64: 8, 16>}, {pipeline_mode = #tpu.pipeline_mode<synchronous>, transform_indices = @transform_6, window_bounds = array<i64: 8, 1>}, {transform_indices = @transform_7, window_bounds = array<i64: 8, 128>}]} {
    %c0 = arith.constant 0 : index
    %c0_0 = arith.constant 0 : index
    %0 = vector.load %arg1[%c0, %c0_0] : memref<16x128xf32, #tpu.memory_space<vmem>>, vector<16x128xf32>
    %c0_1 = arith.constant 0 : index
    %c0_2 = arith.constant 0 : index
    %1 = vector.load %arg2[%c0_1, %c0_2] : memref<32x16xf32, #tpu.memory_space<vmem>>, vector<32x16xf32>
    %cst = arith.constant dense<0.000000e+00> : vector<32x128xf32>
    %2 = tpu.matmul %1, %0, %cst {dimension_numbers = #tpu.dot_dimension_numbers<[1], [0], [0], [1], [0, 0, 1, 1], [], []>} : vector<32x16xf32>, vector<16x128xf32>, vector<32x128xf32> -> vector<32x128xf32>
    %c0_3 = arith.constant 0 : index
    %c0_4 = arith.constant 0 : index
    %3 = vector.load %arg3[%c0_3, %c0_4] : memref<32x1xf32, #tpu.memory_space<vmem>>, vector<32x1xf32>
    %4 = vector.broadcast %3 : vector<32x1xf32> to vector<32x128xf32>
    %5 = arith.addf %2, %4 : vector<32x128xf32>
    %cst_5 = arith.constant 0.000000e+00 : f32
    %6 = vector.broadcast %cst_5 : f32 to vector<32x128xf32>
    %7 = arith.maximumf %5, %6 : vector<32x128xf32>
    %c0_6 = arith.constant 0 : index
    %c0_7 = arith.constant 0 : index
    %8 = vector.load %arg4[%c0_6, %c0_7] : memref<16x32xf32, #tpu.memory_space<vmem>>, vector<16x32xf32>
    %cst_8 = arith.constant dense<0.000000e+00> : vector<16x128xf32>
    %9 = tpu.matmul %8, %7, %cst_8 {dimension_numbers = #tpu.dot_dimension_numbers<[1], [0], [0], [1], [0, 0, 1, 1], [], []>} : vector<16x32xf32>, vector<32x128xf32>, vector<16x128xf32> -> vector<16x128xf32>
    %c0_9 = arith.constant 0 : index
    %c0_10 = arith.constant 0 : index
    %10 = vector.load %arg5[%c0_9, %c0_10] : memref<16x1xf32, #tpu.memory_space<vmem>>, vector<16x1xf32>
    %11 = vector.broadcast %10 : vector<16x1xf32> to vector<16x128xf32>
    %12 = arith.addf %9, %11 : vector<16x128xf32>
    %cst_11 = arith.constant 0.000000e+00 : f32
    %13 = vector.broadcast %cst_11 : f32 to vector<16x128xf32>
    %14 = arith.maximumf %12, %13 : vector<16x128xf32>
    %c0_12 = arith.constant 0 : index
    %c0_13 = arith.constant 0 : index
    %15 = vector.load %arg6[%c0_12, %c0_13] : memref<8x16xf32, #tpu.memory_space<vmem>>, vector<8x16xf32>
    %cst_14 = arith.constant dense<0.000000e+00> : vector<8x128xf32>
    %16 = tpu.matmul %15, %14, %cst_14 {dimension_numbers = #tpu.dot_dimension_numbers<[1], [0], [0], [1], [0, 0, 1, 1], [], []>} : vector<8x16xf32>, vector<16x128xf32>, vector<8x128xf32> -> vector<8x128xf32>
    %c0_15 = arith.constant 0 : index
    %c0_16 = arith.constant 0 : index
    %17 = vector.load %arg7[%c0_15, %c0_16] : memref<8x1xf32, #tpu.memory_space<vmem>>, vector<8x1xf32>
    %18 = vector.broadcast %17 : vector<8x1xf32> to vector<8x128xf32>
    %19 = arith.addf %16, %18 : vector<8x128xf32>
    %c0_17 = arith.constant 0 : index
    %c0_18 = arith.constant 0 : index
    %20 = vector.load %arg8[%c0_17, %c0_18] : memref<8x128xf32, #tpu.memory_space<vmem>>, vector<8x128xf32>
    tpu.vector_store %arg8[%c0_17, %c0_18], %19 {strides = array<i32>} : memref<8x128xf32, #tpu.memory_space<vmem>>, vector<8x128xf32>,
    return
  }
  func.func @transform_0(%arg0: i32) -> (i32, i32) {
    %c0_i32 = arith.constant 0 : i32
    %c0_i32_0 = arith.constant 0 : i32
    return %c0_i32, %arg0 : i32, i32
  }
  func.func @transform_1(%arg0: i32) -> (i32, i32) {
    %c0_i32 = arith.constant 0 : i32
    %c0_i32_0 = arith.constant 0 : i32
    %c0_i32_1 = arith.constant 0 : i32
    return %c0_i32, %c0_i32_0 : i32, i32
  }
  func.func @transform_2(%arg0: i32) -> (i32, i32) {
    %c0_i32 = arith.constant 0 : i32
    %c0_i32_0 = arith.constant 0 : i32
    %c0_i32_1 = arith.constant 0 : i32
    return %c0_i32, %c0_i32_0 : i32, i32
  }
  func.func @transform_3(%arg0: i32) -> (i32, i32) {
    %c0_i32 = arith.constant 0 : i32
    %c0_i32_0 = arith.constant 0 : i32
    %c0_i32_1 = arith.constant 0 : i32
    return %c0_i32, %c0_i32_0 : i32, i32
  }
  func.func @transform_4(%arg0: i32) -> (i32, i32) {
    %c0_i32 = arith.constant 0 : i32
    %c0_i32_0 = arith.constant 0 : i32
    %c0_i32_1 = arith.constant 0 : i32
    return %c0_i32, %c0_i32_0 : i32, i32
  }
  func.func @transform_5(%arg0: i32) -> (i32, i32) {
    %c0_i32 = arith.constant 0 : i32
    %c0_i32_0 = arith.constant 0 : i32
    %c0_i32_1 = arith.constant 0 : i32
    return %c0_i32, %c0_i32_0 : i32, i32
  }
  func.func @transform_6(%arg0: i32) -> (i32, i32) {
    %c0_i32 = arith.constant 0 : i32
    %c0_i32_0 = arith.constant 0 : i32
    %c0_i32_1 = arith.constant 0 : i32
    return %c0_i32, %c0_i32_0 : i32, i32
  }
  func.func @transform_7(%arg0: i32) -> (i32, i32) {
    %c0_i32 = arith.constant 0 : i32
    %c0_i32_0 = arith.constant 0 : i32
    return %c0_i32, %arg0 : i32, i32
  }
}

</mosaic_0001>

<bundles_post_ra>
// kernel: peatnet_forward.1
= control target key start
LH: loop header
LB: loop body
LE: loop exit
PB: predicated region body
PF: predicated region fallthrough
CT: control target
= control target key end

     0   :  { %s859_s24 = smov 0   ;;  %s861_s25 = smov 0   ;;  %s962_s0 = inlined_call_operand.vmem [shape: f32[16,384], index: 0, kind: input, shape index: {}]   ;;  %s963_s1 = inlined_call_operand.vmem [shape: f32[32,16], index: 1, kind: input, shape index: {}]   ;;  %s964_s2 = inlined_call_operand.vmem [shape: f32[32,1], index: 2, kind: input, shape index: {}]   ;;  %s965_s3 = inlined_call_operand.vmem [shape: f32[16,32], index: 3, kind: input, shape index: {}]   ;;  %s966_s4 = inlined_call_operand.vmem [shape: f32[16,1], index: 4, kind: input, shape index: {}]   ;;  %s967_s5 = inlined_call_operand.vmem [shape: f32[8,16], index: 5, kind: input, shape index: {}]   ;;  %s968_s6 = inlined_call_operand.vmem [shape: f32[8,1], index: 6, kind: input, shape index: {}]   ;;  %s969_s7 = inlined_call_operand.vmem [shape: f32[8,384], index: 7, kind: output, shape index: {}]  }
   0x1   :  { %s863_s26 = smov 0  }
   0x2 LB: > { %s685_s27 = sadd.s32 4294967295, %s813_s26   ;;  %s876_s28 = sadd.s32 1, %s813_s26   ;;  %s813_s26 = sphi %s863_s26, %s972_s26   ;;  %s809_s25 = sphi %s861_s25, %s971_s25   ;;  %s805_s24 = sphi %s859_s24, %s970_s24  }
   0x3   : > { %s21_s29 = ssub.s32 %s813_s26, %s876_s28  ;;  %s24_s30 = sadd.s32 1, %s809_s25 }
   0x4   : > { %p22_p0 = scmp.eq.s32.totalorder %s21_s29, 0  ;;  %p31_p1 = scmp.ne.s32.totalorder %s809_s25, %s805_s24 }
   0x5   : > { %p32_p2 = scmp.eq.s32.totalorder %s813_s26, 0  ;;  %p688_p4 = scmp.ge.s32.totalorder %s813_s26, 3 }
   0x6   : > { %s885_s8 = scalar_select %p22_p0, %s809_s25, %s24_s30  }
   0x7   : > { %p33_p3 = por %p32_p2, %p31_p1  ;;  %227 = sbr.rel (%p688_p4) target bundleno = 21 (0x15), region = 40 }
   0xe   : > { %230 = sbr.rel (!%p33_p3) target bundleno = 21 (0x15), region = 44  ;;  %s232_s9 = sand.u32 (%p33_p3), 1, %s809_s25  }
   0xf   : > { %s690_s10 = sshll.u32 (%p33_p3), %s813_s26, 3  ;;  %s689_s11 = sshll.u32 (%p33_p3), %s232_s9, 4 }
  0x10   : > { %s236_s14 = scalar_lea.vmem (%p33_p3), %s962_s0, %s690_s10  ;;  %s234_s15 = scalar_lea.vmem (%p33_p3), [#allocation2], %s689_s11 }
  0x11   : > { %v266_v0 = vld [vmem:[%s236_s14] sm:$0xff] (%p33_p3)  ;;  %v268_v1 = vld [vmem:[%s236_s14 + $0x18] sm:$0xff] (%p33_p3) }
  0x12   : > { %267 = vst [vmem:[%s234_s15] sm:$0xff] (%p33_p3), %v266_v0  ;;  %269 = vst [vmem:[%s234_s15 + $0x8] sm:$0xff] (%p33_p3), %v268_v1 }
  0x15 PF: > { %p691_p5 = scmp.ge.s32.totalorder %s813_s26, 1  ;;  %p274_p6 = scmp.lt.s32.totalorder %s813_s26, 4 }
  0x17   : > { %p275_p7 = pnand %p691_p5, %p274_p6 }
  0x18   : > { %s281_s16 = sand.u32 (!%p275_p7), 1, %s805_s24   ;;  %v317_v2 = vld [vmem:[%s963_s1] sm:$0xff] (!%p275_p7)  ;;  %vm345_vm0 = vcmask (!%p275_p7), 130048   ;;  %v815_v3 = vmov (!%p275_p7), 0   ;;  %v323_v5 = vld [vmem:[%s964_s2 + $0x10] sm:$0xff] (!%p275_p7)  ;;  %v322_v8 = vld [vmem:[%s964_s2 + $0x8] sm:$0xff] (!%p275_p7) }
  0x19   : > { %278 = sbr.rel (%p275_p7) target bundleno = 698 (0x2ba), region = 82  ;;  %s692_s19 = sshll.u32 (!%p275_p7), %s281_s16, 4  ;;  %722 = vmatprep.mubr.msk.f32.mxu0 (!%p275_p7), %vm345_vm0, %v317_v2  ;;  %789 = vset.pattern.permute.xlu0 (!%p275_p7), %v815_v3  ;;  %v321_v4 = vld [vmem:[%s964_s2] sm:$0xff] (!%p275_p7)  ;;  %v324_v10 = vld [vmem:[%s964_s2 + $0x18] sm:$0xff] (!%p275_p7)  ;;  %v318_v11 = vld [vmem:[%s963_s1 + $0x8] sm:$0xff] (!%p275_p7)  ;;  %vm461_vm1 = vcmask (!%p275_p7), 261120  }
  0x1a   : > { %327 = vperm.xlu0 (!%p275_p7), %789, %v321_v4   ;;  %790 = vset.pattern.permute.xlu1 (!%p275_p7), %v815_v3  ;;  %s283_s24 = scalar_lea.vmem (!%p275_p7), [#allocation2], %s692_s19  ;;  %v449_v12 = vld [vmem:[%s966_s4] sm:$0xff] (!%p275_p7)  ;;  %v319_v13 = vld [vmem:[%s963_s1 + $0x10] sm:$0xff] (!%p275_p7)  ;;  %v450_v14 = vld [vmem:[%s966_s4 + $0x8] sm:$0xff] (!%p275_p7)  ;;  %v816_v37 = vmov (!%p275_p7), 0.0|0.0   ;;  %vm817_vm2 = vmmov (!%p275_p7), 0  }
  0x1b   : > { %v315_v6 = vld [vmem:[%s283_s24] sm:$0xff] (!%p275_p7)  ;;  %v316_v7 = vld [vmem:[%s283_s24 + $0x8] sm:$0xff] (!%p275_p7)  ;;  %337 = vperm.xlu1 (!%p275_p7), %790, %v323_v5   ;;  %v818_v38 = vmov (!%p275_p7), 0.0   ;;  %p311_p8 = scmp.lt.s32.totalorder (!%p275_p7), %s685_s27, 2 }
  0x1c   : > { %v746_v9 = vpack.c.bf16 (!%p275_p7), %v316_v7, %v315_v6  ;;  %v320_v15 = vld [vmem:[%s963_s1 + $0x18] sm:$0xff] (!%p275_p7)  ;;  %v546_v16 = vld [vmem:[%s968_s6] sm:$0xff] (!%p275_p7)  ;;  %v448_v36 = vld [vmem:[%s965_s3 + $0x8] sm:$0xff] (!%p275_p7) }
  0x1d   : > { %v447_v17 = vld [vmem:[%s965_s3] sm:$0xff] (!%p275_p7) }
  0x1e   : > { %747 = vmatprep.subr.bf16.mxu0 (!%p275_p7), %v746_v9  ;;  %332 = vperm.xlu0 (!%p275_p7), %789, %v322_v8   ;;  %v545_v48 = vld [vmem:[%s967_s5] sm:$0xff] (!%p275_p7) }
  0x1f   : > { %749 = vmatpush3.bf16.msra.mxu0 (!%p275_p7), %v746_v9  ;;  %342 = vperm.xlu1 (!%p275_p7), %790, %v324_v10  }
  0x20   : > { %736 = vmatprep.mubr.msk.f32.mxu1 %vm461_vm1, %v447_v17  ;;  %758 = vmatprep.subr.bf16.mxu0 %v816_v37  ;;  %s974_s27 = smov (!%p311_p8, %s685_s27), 2 }
  0x21   : > { %s693_s11 = sshll.u32 %s974_s27, 3 }
  0x22   : > { %723 = vmatmul.mubr.msk.f32.vlgmr.msra.gmra.mrb[0].mxu0 %vm345_vm0, %v318_v11  ;;  %453 = vperm.xlu0 %789, %v449_v12   ;;  %s314_s14 = scalar_lea.vmem %s969_s7, %s693_s11 }
  0x23   : > { %725 = vmatprep.mubr.msk.f32.mxu0 %vm345_vm0, %v319_v13  ;;  %458 = vperm.xlu1 %790, %v450_v14  }
  0x26   : > { %726 = vmatmul.mubr.msk.f32.gmra.mrb[2].mxu0 %vm345_vm0, %v320_v15  ;;  %549 = vperm.xlu0 %789, %v546_v16  }
  0x27   : > { %743 = vmatprep.mubr.msk.f32.mxu0 %vm817_vm2, %v818_v38 }
  0x99   : > { %v328_v18 = vpop.permute.xlu0 %327 }
  0x9a   : > { %v338_v19 = vpop.permute.xlu1 %337 }
  0x9d   : > { %v333_v20 = vpop.permute.xlu0 %332 }
  0x9e   : > { %v343_v26 = vpop.permute.xlu1 %342 }
  0xa1   : > { %v454_v41 = vpop.permute.xlu0 %453 }
  0xa2   : > { %v459_v39 = vpop.permute.xlu1 %458 }
  0xa5   : > { %v550_v49 = vpop.permute.xlu0 %549 }
  0xf5   : > { %v724_v21 = vpop.f32.mrb[0].mxu0 }
  0xf6   : > { %v430_v22 = vadd.f32 %v724_v21, %v333_v20  ;;  %v424_v23 = vpop.f32.mrb[1].mxu0 }
  0xf7   : > { %v425_v24 = vadd.f32 %v424_v23, %v328_v18 }
  0xf8   : > { %v444_v25 = vmax.f32 %v430_v22, 0.0 }
  0xf9   : > { %v443_v27 = vmax.f32 %v425_v24, 0.0  ;;  %v727_v28 = vpop.f32.mrb[2].mxu0 }
  0xfa   : > { %v440_v29 = vadd.f32 %v727_v28, %v343_v26  ;;  %v434_v30 = vpop.f32.mrb[3].mxu0 }
  0xfb   : > { %v435_v31 = vadd.f32 %v434_v30, %v338_v19  ;;  %v750_v32 = vpack.c.bf16 %v444_v25, %v443_v27 }
  0xfc   : > { %v446_v33 = vmax.f32 %v440_v29, 0.0 }
  0xfd   : > { %v445_v34 = vmax.f32 %v435_v31, 0.0  ;;  %751 = vmatprep.subr.bf16.mxu1 %v750_v32 }
  0xfe   : > { %753 = vmatpush3.bf16.msra.mxu1 %v750_v32 }
  0xff   : > { %v754_v35 = vpack.c.bf16 %v446_v33, %v445_v34 }
 0x101   : > { %755 = vmatprep.subr.bf16.mxu1 %v754_v35 }
 0x102   : > { %757 = vmatpush3.bf16.msra.mxu1 %v754_v35 }
 0x105   : > { %737 = vmatmul.mubr.msk.f32.vlgmr.msra.gmra.mrb[0].mxu1 %vm461_vm1, %v448_v36 }
 0x1d8   : > { %v738_v40 = vpop.f32.mrb[0].mxu1 }
 0x1d9   : > { %v540_v42 = vadd.f32 %v738_v40, %v459_v39  ;;  %v534_v43 = vpop.f32.mrb[1].mxu1 }
 0x1da   : > { %v535_v44 = vadd.f32 %v534_v43, %v454_v41 }
 0x1db   : > { %v544_v45 = vmax.f32 %v540_v42, 0.0 }
 0x1dc   : > { %v543_v46 = vmax.f32 %v535_v44, 0.0 }
 0x1de   : > { %v759_v47 = vpack.c.bf16 %v544_v45, %v543_v46 }
 0x1e0   : > { %760 = vmatpush3.bf16.msra.mxu0 %v759_v47 }
 0x1e3   : > { %744 = vmatmul.mubr.msk.f32.vlgmr.msra.gmra.mrb[4].mxu0 %vm345_vm0, %v545_v48 }
 0x2b6   : > { %v621_v50 = vpop.f32.mrb[4].mxu0 }
 0x2b7   : > { %v622_v51 = vadd.f32 %v621_v50, %v550_v49  ;;  %v745_v52 = vpop.f32.mrb[5].mxu0 }
 0x2b9   : > { %625 = vst [vmem:[%s314_s14] sm:$0xff] %v622_v51 }
 0x2ba PF: > { %p14_p9 = scmp.ge.s32.totalorder %s876_s28, 5   ;;  %s970_s24 = smov %s809_s25 }
 0x2bb   : > { %s971_s25 = smov %s885_s8  ;;  %s972_s26 = smov %s876_s28 }
 0x2bc   :  { %16 = sbr.rel (!%p14_p9) target bundleno = 2 (0x2), region = 121 }

</bundles_post_ra>
